<compile_context>
chip_gen: v6e
topology: v6e:2x2x1
jax: 0.10.0
libtpu: 0.0.40
codegen_flags: <defaults>
</compile_context>

<pallas_src>
import functools
import math

import jax
import jax.numpy as jnp
from jax.experimental import pallas as pl
from jax.experimental.pallas import tpu as pltpu

EPS = 1e-5
LANE = 128               # TPU lane width; all feature dims are padded to this.

# Row layout of the packed slab handed to the kernel.
ROW_W1 = 0               # rows [0, 128)   : W1' = diag(gain1) @ W1 (zero-padded)
ROW_W2 = LANE            # rows [128, 256) : W2' = diag(gain2) @ W2 (zero-padded)
ROW_V = 2 * LANE         # rows [256, 264) : c1, b1, c2, b2, then zero padding
N_PARAM_ROWS = 2 * LANE + 8
ROW_X = N_PARAM_ROWS     # rows [264, 264+N) : lane-padded node features


def gcn_kernel(adj_ref, slab_ref, o_ref):
    """Fused GCN forward on lane-padded operands.

    adj_ref  : (N, N)            dense adjacency (native width, not padded)
    slab_ref : (264 + N, 128)    packed params + node features (see ROW_* above)
    o_ref    : (N, 128)          output, cols >= h2 are zero
    """
    n = o_ref.shape[0]

    adj = adj_ref[...]
    w1 = slab_ref[ROW_W1:ROW_W1 + LANE, :]          # static, tile-aligned slices
    w2 = slab_ref[ROW_W2:ROW_W2 + LANE, :]
    v = slab_ref[ROW_V:ROW_V + 8, :]                # one aligned (8,128) load
    x = slab_ref[ROW_X:ROW_X + n, :]

    c1, b1 = v[0:1, :], v[1:2, :]
    c2, b2 = v[2:3, :], v[3:4, :]

    # gc1 with gn1 folded into w1/c1:  relu(adj @ (x @ W1' + c1) + b1)
    support1 = jnp.dot(x, w1, preferred_element_type=jnp.float32) + c1
    h = jnp.dot(adj, support1, preferred_element_type=jnp.float32) + b1
    h = jnp.maximum(h, 0.0)

    # gc2 with gn2 folded into w2/c2:  adj @ (h @ W2' + c2) + b2
    support2 = jnp.dot(h, w2, preferred_element_type=jnp.float32) + c2
    out = jnp.dot(adj, support2, preferred_element_type=jnp.float32) + b2

    o_ref[...] = out.astype(o_ref.dtype)


def pack_params(params):
    """One-time packing of the static parameters into a (264, 128) slab.

    Folds both GraphNorm affines into the GraphConvolution weights:
      gain = scale * (1 - alpha) / sqrt(eps)      (var == 0 exactly, 2-D input)
      W'   = diag(gain) @ W
      c    = shift @ W
    Padded rows/cols are exactly zero, so lane-padded activations stay zero.
    """
    nfeat, h1 = params["w1"].shape
    h2 = params["w2"].shape[1]
    inv_sqrt_eps = 1.0 / math.sqrt(EPS)

    gain1 = params["scale1"] * (1.0 - params["alpha1"]) * inv_sqrt_eps  # (1, nfeat)
    gain2 = params["scale2"] * (1.0 - params["alpha2"]) * inv_sqrt_eps  # (1, h1)

    w1p = gain1.T * params["w1"]              # (nfeat, h1)
    w2p = gain2.T * params["w2"]              # (h1, h2)
    c1 = params["shift1"] @ params["w1"]      # (1, h1)
    c2 = params["shift2"] @ params["w2"]      # (1, h2)

    slab = jnp.zeros((N_PARAM_ROWS, LANE), jnp.float32)
    slab = slab.at[ROW_W1:ROW_W1 + nfeat, :h1].set(w1p)
    slab = slab.at[ROW_W2:ROW_W2 + h1, :h2].set(w2p)
    slab = slab.at[ROW_V + 0, :h1].set(c1[0])
    slab = slab.at[ROW_V + 1, :h1].set(params["b1"][0])
    slab = slab.at[ROW_V + 2, :h2].set(c2[0])
    slab = slab.at[ROW_V + 3, :h2].set(params["b2"][0])
    return slab


@functools.partial(jax.jit, static_argnames=("h2",))
def gcn_forward_packed(x, adj, param_slab, *, h2):
    """Per-call path: pad x, append below the static slab, run the kernel."""
    N, nfeat = x.shape
    assert N % 8 == 0, "toy path assumes N divisible by 8 (sublane tile)"

    x_pad = jnp.pad(x, ((0, 0), (0, LANE - nfeat)))
    slab = jnp.concatenate([param_slab, x_pad], axis=0)   # (264 + N, 128)

    vmem = pl.BlockSpec(memory_space=pltpu.MemorySpace.VMEM)
    out_pad = pl.pallas_call(
        gcn_kernel,
        out_shape=jax.ShapeDtypeStruct((N, LANE), jnp.float32),
        in_specs=[vmem, vmem],
        out_specs=vmem,
    )(adj, slab)

    # Slice fuses into the jit; downstream consumers could also take the
    # lane-padded slab directly and skip this.
    return out_pad[:, :h2]


def gcn_forward(x, adj, params):
    """Convenience wrapper: pack params (static, do this once) + jitted call."""
    h2 = params["w2"].shape[1]
    param_slab = pack_params(params)
    return gcn_forward_packed(x, adj, param_slab, h2=h2)


def gcn_reference(x, adj, params):
    """Pure-JAX reference mirroring the PyTorch forward literally."""
    def gn(v, a, s, sh):
        mean = v                          # trailing view dim has size 1
        var = v * v - mean * mean         # exactly 0
        vn = (v - a * mean) / jnp.sqrt(var + EPS)
        return s * vn + sh

    h = gn(x, params["alpha1"], params["scale1"], params["shift1"])
    h = adj @ (h @ params["w1"]) + params["b1"]
    h = jnp.maximum(h, 0.0)
    h = gn(h, params["alpha2"], params["scale2"], params["shift2"])
    out = adj @ (h @ params["w2"]) + params["b2"]
    return out


def init_params(key, nfeat, nhid):
    h1 = nhid // 2
    h2 = nhid
    ks = jax.random.split(key, 10)
    stdv1 = 1.0 / math.sqrt(h1)
    stdv2 = 1.0 / math.sqrt(h2)
    # Per-feature params kept as (1, C) rows.  GraphNorm defaults (alpha=1,
    # scale=1, shift=0) make its output identically zero; perturb
    # deterministically so the fused pipeline exercises non-trivial values.
    return {
        "w1": jax.random.uniform(ks[0], (nfeat, h1), jnp.float32, -stdv1, stdv1),
        "b1": jax.random.uniform(ks[1], (1, h1), jnp.float32, -stdv1, stdv1),
        "w2": jax.random.uniform(ks[2], (h1, h2), jnp.float32, -stdv2, stdv2),
        "b2": jax.random.uniform(ks[3], (1, h2), jnp.float32, -stdv2, stdv2),
        "alpha1": 1.0 + 0.05 * jax.random.normal(ks[4], (1, nfeat), jnp.float32),
        "scale1": 1.0 + 0.05 * jax.random.normal(ks[5], (1, nfeat), jnp.float32),
        "shift1": 0.05 * jax.random.normal(ks[6], (1, nfeat), jnp.float32),
        "alpha2": 1.0 + 0.05 * jax.random.normal(ks[7], (1, h1), jnp.float32),
        "scale2": 1.0 + 0.05 * jax.random.normal(ks[8], (1, h1), jnp.float32),
        "shift2": 0.05 * jax.random.normal(ks[9], (1, h1), jnp.float32),
    }


if __name__ == "__main__":
    N, NFEAT, NHID = 16, 8, 32

    key = jax.random.PRNGKey(0)
    kx, kadj, kp = jax.random.split(key, 3)

    x = jax.random.normal(kx, (N, NFEAT), jnp.float32)

    # Symmetric random adjacency with self-loops, row-normalized.
    a = jax.random.uniform(kadj, (N, N), jnp.float32)
    a = (a + a.T) * 0.5 + jnp.eye(N, dtype=jnp.float32)
    adj = a / jnp.sum(a, axis=1, keepdims=True)

    params = init_params(kp, NFEAT, NHID)

    # Static parameter packing is hoisted out of the per-call path.
    param_slab = jax.block_until_ready(pack_params(params))

    out = gcn_forward_packed(x, adj, param_slab, h2=NHID)
    out = jax.block_until_ready(out)

    ref = gcn_reference(x, adj, params)
    assert out.shape == (N, NHID), out.shape
    assert jnp.allclose(out, ref, rtol=1e-4, atol=1e-3), \
        float(jnp.max(jnp.abs(out - ref)))

    print("KERNEL_OK")
</pallas_src>

<mosaic_0001>
module attributes {stable_mosaic.version = 11 : i64} {
  func.func @gcn_kernel(%arg0: memref<16x16xf32, #tpu.memory_space<vmem>>, %arg1: memref<280x128xf32, #tpu.memory_space<vmem>>, %arg2: memref<16x128xf32, #tpu.memory_space<vmem>>) attributes {dimension_semantics = [], scalar_prefetch = 0 : i64, scratch_operands = 0 : i64, tpu.core_type = #tpu.core_type<tc>} {
    %c0 = arith.constant 0 : index
    %c0_0 = arith.constant 0 : index
    %0 = vector.load %arg0[%c0, %c0_0] : memref<16x16xf32, #tpu.memory_space<vmem>>, vector<16x16xf32>
    %c0_1 = arith.constant 0 : index
    %c0_2 = arith.constant 0 : index
    %1 = vector.load %arg1[%c0_1, %c0_2] : memref<280x128xf32, #tpu.memory_space<vmem>>, vector<128x128xf32>
    %c128 = arith.constant 128 : index
    %c0_3 = arith.constant 0 : index
    %2 = vector.load %arg1[%c128, %c0_3] : memref<280x128xf32, #tpu.memory_space<vmem>>, vector<128x128xf32>
    %c256 = arith.constant 256 : index
    %c0_4 = arith.constant 0 : index
    %3 = vector.load %arg1[%c256, %c0_4] : memref<280x128xf32, #tpu.memory_space<vmem>>, vector<8x128xf32>
    %c264 = arith.constant 264 : index
    %c0_5 = arith.constant 0 : index
    %4 = vector.load %arg1[%c264, %c0_5] : memref<280x128xf32, #tpu.memory_space<vmem>>, vector<16x128xf32>
    %5 = vector.extract_strided_slice %3 {offsets = [0, 0], sizes = [1, 128], strides = [1, 1]} : vector<8x128xf32> to vector<1x128xf32>
    %6 = vector.extract_strided_slice %3 {offsets = [1, 0], sizes = [1, 128], strides = [1, 1]} : vector<8x128xf32> to vector<1x128xf32>
    %7 = vector.extract_strided_slice %3 {offsets = [2, 0], sizes = [1, 128], strides = [1, 1]} : vector<8x128xf32> to vector<1x128xf32>
    %8 = vector.extract_strided_slice %3 {offsets = [3, 0], sizes = [1, 128], strides = [1, 1]} : vector<8x128xf32> to vector<1x128xf32>
    %cst = arith.constant dense<0.000000e+00> : vector<16x128xf32>
    %9 = tpu.matmul %4, %1, %cst {dimension_numbers = #tpu.dot_dimension_numbers<[1], [0], [0], [1], [0, 0, 1, 1], [], []>} : vector<16x128xf32>, vector<128x128xf32>, vector<16x128xf32> -> vector<16x128xf32>
    %10 = vector.broadcast %5 : vector<1x128xf32> to vector<16x128xf32>
    %11 = arith.addf %9, %10 : vector<16x128xf32>
    %cst_6 = arith.constant dense<0.000000e+00> : vector<16x128xf32>
    %12 = tpu.matmul %0, %11, %cst_6 {dimension_numbers = #tpu.dot_dimension_numbers<[1], [0], [0], [1], [0, 0, 1, 1], [], []>} : vector<16x16xf32>, vector<16x128xf32>, vector<16x128xf32> -> vector<16x128xf32>
    %13 = vector.broadcast %6 : vector<1x128xf32> to vector<16x128xf32>
    %14 = arith.addf %12, %13 : vector<16x128xf32>
    %cst_7 = arith.constant 0.000000e+00 : f32
    %15 = vector.broadcast %cst_7 : f32 to vector<16x128xf32>
    %16 = arith.maximumf %14, %15 : vector<16x128xf32>
    %cst_8 = arith.constant dense<0.000000e+00> : vector<16x128xf32>
    %17 = tpu.matmul %16, %2, %cst_8 {dimension_numbers = #tpu.dot_dimension_numbers<[1], [0], [0], [1], [0, 0, 1, 1], [], []>} : vector<16x128xf32>, vector<128x128xf32>, vector<16x128xf32> -> vector<16x128xf32>
    %18 = vector.broadcast %7 : vector<1x128xf32> to vector<16x128xf32>
    %19 = arith.addf %17, %18 : vector<16x128xf32>
    %cst_9 = arith.constant dense<0.000000e+00> : vector<16x128xf32>
    %20 = tpu.matmul %0, %19, %cst_9 {dimension_numbers = #tpu.dot_dimension_numbers<[1], [0], [0], [1], [0, 0, 1, 1], [], []>} : vector<16x16xf32>, vector<16x128xf32>, vector<16x128xf32> -> vector<16x128xf32>
    %21 = vector.broadcast %8 : vector<1x128xf32> to vector<16x128xf32>
    %22 = arith.addf %20, %21 : vector<16x128xf32>
    %c0_10 = arith.constant 0 : index
    %c0_11 = arith.constant 0 : index
    %23 = vector.load %arg2[%c0_10, %c0_11] : memref<16x128xf32, #tpu.memory_space<vmem>>, vector<16x128xf32>
    tpu.vector_store %arg2[%c0_10, %c0_11], %22 {strides = array<i32>} : memref<16x128xf32, #tpu.memory_space<vmem>>, vector<16x128xf32>,
    return
  }
}

</mosaic_0001>

<bundles_post_ra>
// kernel: gcn_forward_packed.1
= control target key start
LH: loop header
LB: loop body
LE: loop exit
PB: predicated region body
PF: predicated region fallthrough
CT: control target
= control target key end

     0   :  { %s701_s0 = inlined_call_operand.vmem [shape: f32[16,16], index: 0, kind: input, shape index: {}]   ;;  %s702_s1 = inlined_call_operand.vmem [shape: f32[280,128], index: 1, kind: input, shape index: {}]   ;;  %s703_s2 = inlined_call_operand.hbm [shape: f32[16,128], index: 2, kind: output, shape index: {}]  }
   0x1   :  { %v29_v0 = vld [vmem:[%s702_s1 + $0x78] sm:$0xff]  ;;  %v28_v1 = vld [vmem:[%s702_s1 + $0x70] sm:$0xff]  ;;  %v27_v2 = vld [vmem:[%s702_s1 + $0x68] sm:$0xff] }
   0x2   :  { %440 = vmatprep.subr.mxu0 %v29_v0  ;;  %v26_v3 = vld [vmem:[%s702_s1 + $0x60] sm:$0xff]  ;;  %v47_v4 = vld [vmem:[%s702_s1 + $0x108] sm:$0xff]  ;;  %v25_v5 = vld [vmem:[%s702_s1 + $0x58] sm:$0xff] }
   0x3   :  { %441 = vmatpush3.msra.mxu0 %v29_v0  ;;  %472 = vmatprep.mubr.f32.mxu0 %v47_v4 }
   0x4   :  { %442 = vmatprep.subr.mxu0 %v28_v1 }
   0x5   :  { %443 = vmatpush3.msra.mxu0 %v28_v1 }
   0x6   :  { %444 = vmatprep.subr.mxu0 %v27_v2 }
   0x7   :  { %445 = vmatpush3.msra.mxu0 %v27_v2 }
   0x8   :  { %7 = vsyncpa [#allocation3], 0  ;;  %446 = vmatprep.subr.mxu0 %v26_v3  ;;  %v24_v6 = vld [vmem:[%s702_s1 + $0x50] sm:$0xff]  ;;  %v23_v7 = vld [vmem:[%s702_s1 + $0x48] sm:$0xff]  ;;  %vm132_vm0 = vcmask 130048   ;;  %v49_v19 = vlaneseq }
   0x9   :  { %447 = vmatpush3.msra.mxu0 %v26_v3  ;;  %v22_v8 = vld [vmem:[%s702_s1 + $0x40] sm:$0xff]  ;;  %v21_v9 = vld [vmem:[%s702_s1 + $0x38] sm:$0xff]  ;;  %v20_v10 = vld [vmem:[%s702_s1 + $0x30] sm:$0xff] }
   0xa   :  { %448 = vmatprep.subr.mxu0 %v25_v5  ;;  %v19_v11 = vld [vmem:[%s702_s1 + $0x28] sm:$0xff]  ;;  %v18_v12 = vld [vmem:[%s702_s1 + $0x20] sm:$0xff]  ;;  %v17_v13 = vld [vmem:[%s702_s1 + $0x18] sm:$0xff]  ;;  %v626_v20 = vshrl.u32 %v49_v19, 7 }
   0xb   :  { %449 = vmatpush3.msra.mxu0 %v25_v5  ;;  %v16_v14 = vld [vmem:[%s702_s1 + $0x10] sm:$0xff]  ;;  %v15_v15 = vld [vmem:[%s702_s1 + $0x8] sm:$0xff]  ;;  %v14_v16 = vld [vmem:[%s702_s1] sm:$0xff] }
   0xc   :  { %450 = vmatprep.subr.mxu0 %v24_v6  ;;  %v48_v17 = vld [vmem:[%s702_s1 + $0x110] sm:$0xff]  ;;  %v12_v18 = vld [vmem:[%s701_s0] sm:$0xff]  ;;  %v51_v21 = vsub.s32 0, %v626_v20  ;;  %v638_v28 = vld [vmem:[%s701_s0 + $0x8] sm:$0xff]  ;;  %v130_v45 = vsub.s32 1, %v626_v20  ;;  %v218_v53 = vsub.s32 2, %v626_v20 }
   0xd   :  { %451 = vmatpush3.msra.mxu0 %v24_v6  ;;  %479 = vmatprep.mubr.msk.f32.mxu1 %vm132_vm0, %v12_v18  ;;  %v632_v22 = vld [vmem:[%s702_s1 + $0x100] sm:$0xff]  ;;  %v45_v29 = vld [vmem:[%s702_s1 + $0xf8] sm:$0xff]  ;;  %v44_v30 = vld [vmem:[%s702_s1 + $0xf0] sm:$0xff]  ;;  %v297_v59 = vsub.s32 3, %v626_v20 }
   0xe   :  { %452 = vmatprep.subr.mxu0 %v23_v7  ;;  %v52_v23 = vrot.slane %v632_v22, %v51_v21  ;;  %v43_v31 = vld [vmem:[%s702_s1 + $0xe8] sm:$0xff]  ;;  %v42_v32 = vld [vmem:[%s702_s1 + $0xe0] sm:$0xff]  ;;  %v41_v33 = vld [vmem:[%s702_s1 + $0xd8] sm:$0xff]  ;;  %v131_v46 = vrot.slane %v632_v22, %v130_v45  ;;  %v219_v54 = vrot.slane %v632_v22, %v218_v53 }
   0xf   :  { %453 = vmatpush3.msra.mxu0 %v23_v7  ;;  %v40_v34 = vld [vmem:[%s702_s1 + $0xd0] sm:$0xff]  ;;  %v39_v35 = vld [vmem:[%s702_s1 + $0xc8] sm:$0xff]  ;;  %v38_v36 = vld [vmem:[%s702_s1 + $0xc0] sm:$0xff]  ;;  %v298_v60 = vrot.slane %v632_v22, %v297_v59 }
  0x10   :  { %454 = vmatprep.subr.mxu0 %v22_v8  ;;  %v37_v37 = vld [vmem:[%s702_s1 + $0xb8] sm:$0xff]  ;;  %v36_v38 = vld [vmem:[%s702_s1 + $0xb0] sm:$0xff]  ;;  %v35_v39 = vld [vmem:[%s702_s1 + $0xa8] sm:$0xff] }
  0x11   :  { %455 = vmatpush3.msra.mxu0 %v22_v8  ;;  %v34_v40 = vld [vmem:[%s702_s1 + $0xa0] sm:$0xff]  ;;  %v33_v41 = vld [vmem:[%s702_s1 + $0x98] sm:$0xff]  ;;  %v32_v42 = vld [vmem:[%s702_s1 + $0x90] sm:$0xff] }
  0x12   :  { %456 = vmatprep.subr.mxu0 %v21_v9  ;;  %v31_v43 = vld [vmem:[%s702_s1 + $0x88] sm:$0xff]  ;;  %v30_v44 = vld [vmem:[%s702_s1 + $0x80] sm:$0xff]  ;;  %s549_s1 = smov [#allocation2]  }
  0x13   :  { %457 = vmatpush3.msra.mxu0 %v21_v9  ;;  %s381_s26 = sshll.u32 %s549_s1, 4  ;;  %s382_s26 = int_to_ptr.vmem [resolvable:$true] %s381_s26 }
  0x14   :  { %458 = vmatprep.subr.mxu0 %v20_v10  ;;  %s527_s27 = scalar_lea.vmem %s382_s26, 256  ;;  %p532_p1 = scmp.lt.s32.totalorder %s382_s26, %s382_s26 }
  0x15   :  { %459 = vmatpush3.msra.mxu0 %v20_v10  ;;  %p528_p0 = scmp.ne.s32.totalorder %s382_s26, %s527_s27  ;;  %p533_p2 = scmp.lt.s32.totalorder %s527_s27, %s527_s27 }
  0x16   :  { %460 = vmatprep.subr.mxu0 %v19_v11 }
  0x17   :  { %461 = vmatpush3.msra.mxu0 %v19_v11  ;;  %p534_p3 = por %p533_p2, %p532_p1 }
  0x18   :  { %462 = vmatprep.subr.mxu0 %v18_v12 }
  0x19   :  { %463 = vmatpush3.msra.mxu0 %v18_v12  ;;  %p535_p4 = pnand %p534_p3, %p528_p0 }
  0x1a   :  { %464 = vmatprep.subr.mxu0 %v17_v13 }
  0x1b   :  { %465 = vmatpush3.msra.mxu0 %v17_v13 }
  0x1c   :  { %466 = vmatprep.subr.mxu0 %v16_v14 }
  0x1d   :  { %467 = vmatpush3.msra.mxu0 %v16_v14 }
  0x1e   :  { %468 = vmatprep.subr.mxu0 %v15_v15 }
  0x1f   :  { %469 = vmatpush3.msra.mxu0 %v15_v15 }
  0x20   :  { %470 = vmatprep.subr.mxu0 %v14_v16 }
  0x21   :  { %471 = vmatpush3.msra.mxu0 %v14_v16 }
  0x22   :  { %473 = vmatmul.mubr.f32.vlgmr.msra.gmra.mxu0 %v48_v17 }
  0x23   :  { %521 = vmatprep.mubr.msk.f32.mxu0 %vm132_vm0, %v12_v18 }
  0xe2   :  { %v474_v24 = vpop.f32.mrf.mxu0 }
  0xe3   :  { %v125_v25 = vadd.f32 %v474_v24, %v52_v23 }
  0xe4   :  { %v119_v26 = vpop.f32.mrf.mxu0 }
  0xe5   :  { %v120_v27 = vadd.f32 %v119_v26, %v52_v23  ;;  %475 = vmatprep.subr.mxu1 %v125_v25 }
  0xe6   :  { %476 = vmatpush3.msra.mxu1 %v125_v25 }
  0xe7   :  { %477 = vmatprep.subr.mxu1 %v120_v27 }
  0xe8   :  { %478 = vmatpush3.msra.mxu1 %v120_v27 }
  0xe9   :  { %480 = vmatmul.mubr.msk.f32.vlgmr.msra.gmra.mxu1 %vm132_vm0, %v638_v28  ;;  %482 = vmatprep.subr.mxu1 %v45_v29 }
  0xea   :  { %483 = vmatpush3.msra.mxu1 %v45_v29 }
  0xeb   :  { %484 = vmatprep.subr.mxu1 %v44_v30 }
  0xec   :  { %485 = vmatpush3.msra.mxu1 %v44_v30 }
  0xed   :  { %486 = vmatprep.subr.mxu1 %v43_v31 }
  0xee   :  { %487 = vmatpush3.msra.mxu1 %v43_v31 }
  0xef   :  { %488 = vmatprep.subr.mxu1 %v42_v32 }
  0xf0   :  { %489 = vmatpush3.msra.mxu1 %v42_v32 }
  0xf1   :  { %490 = vmatprep.subr.mxu1 %v41_v33 }
  0xf2   :  { %491 = vmatpush3.msra.mxu1 %v41_v33 }
  0xf3   :  { %492 = vmatprep.subr.mxu1 %v40_v34 }
  0xf4   :  { %493 = vmatpush3.msra.mxu1 %v40_v34 }
  0xf5   :  { %494 = vmatprep.subr.mxu1 %v39_v35 }
  0xf6   :  { %495 = vmatpush3.msra.mxu1 %v39_v35 }
  0xf7   :  { %496 = vmatprep.subr.mxu1 %v38_v36 }
  0xf8   :  { %497 = vmatpush3.msra.mxu1 %v38_v36 }
  0xf9   :  { %498 = vmatprep.subr.mxu1 %v37_v37 }
  0xfa   :  { %499 = vmatpush3.msra.mxu1 %v37_v37 }
  0xfb   :  { %500 = vmatprep.subr.mxu1 %v36_v38 }
  0xfc   :  { %501 = vmatpush3.msra.mxu1 %v36_v38 }
  0xfd   :  { %502 = vmatprep.subr.mxu1 %v35_v39 }
  0xfe   :  { %503 = vmatpush3.msra.mxu1 %v35_v39 }
  0xff   :  { %504 = vmatprep.subr.mxu1 %v34_v40 }
 0x100   :  { %505 = vmatpush3.msra.mxu1 %v34_v40 }
 0x101   :  { %506 = vmatprep.subr.mxu1 %v33_v41 }
 0x102   :  { %507 = vmatpush3.msra.mxu1 %v33_v41 }
 0x103   :  { %508 = vmatprep.subr.mxu1 %v32_v42 }
 0x104   :  { %509 = vmatpush3.msra.mxu1 %v32_v42 }
 0x105   :  { %510 = vmatprep.subr.mxu1 %v31_v43 }
 0x106   :  { %511 = vmatpush3.msra.mxu1 %v31_v43 }
 0x107   :  { %512 = vmatprep.subr.mxu1 %v30_v44 }
 0x108   :  { %513 = vmatpush3.msra.mxu1 %v30_v44 }
 0x1a9   :  { %v481_v47 = vpop.f32.mrf.mxu1 }
 0x1aa   :  { %v211_v48 = vadd.f32 %v481_v47, %v131_v46 }
 0x1ab   :  { %v205_v49 = vpop.f32.mrf.mxu1 }
 0x1ac   :  { %v206_v50 = vadd.f32 %v205_v49, %v131_v46  ;;  %v215_v52 = vmax.f32 %v211_v48, 0.0 }
 0x1ae   :  { %v214_v51 = vmax.f32 %v206_v50, 0.0 }
 0x1b0   :  { %514 = vmatprep.mubr.f32.mxu1 %v214_v51 }
 0x1b1   :  { %515 = vmatmul.mubr.f32.vlgmr.msra.gmra.mxu1 %v215_v52 }
 0x271   :  { %v516_v55 = vpop.f32.mrf.mxu1 }
 0x272   :  { %v292_v56 = vadd.f32 %v516_v55, %v219_v54 }
 0x273   :  { %v286_v57 = vpop.f32.mrf.mxu1 }
 0x274   :  { %v287_v58 = vadd.f32 %v286_v57, %v219_v54  ;;  %517 = vmatprep.subr.mxu0 %v292_v56 }
 0x275   :  { %518 = vmatpush3.msra.mxu0 %v292_v56 }
 0x276   :  { %519 = vmatprep.subr.mxu0 %v287_v58 }
 0x277   :  { %520 = vmatpush3.msra.mxu0 %v287_v58 }
 0x278   :  { %522 = vmatmul.mubr.msk.f32.vlgmr.msra.gmra.mxu0 %vm132_vm0, %v638_v28 }
 0x338   :  { %v523_v61 = vpop.f32.mrf.mxu0 }
 0x339   :  { %v371_v62 = vadd.f32 %v523_v61, %v298_v60 }
 0x33a   :  { %v365_v63 = vpop.f32.mrf.mxu0 }
 0x33b   :  { %375 = vst [vmem:[#allocation2 + $0x8] sm:$0xff] %v371_v62  ;;  %v366_v0 = vadd.f32 %v365_v63, %v298_v60 }
 0x33d   :  { %374 = vst [vmem:[#allocation2] sm:$0xff] %v366_v0 }
 0x33e   :  { %538 = shalt.err (!%p535_p4)
}
 0x33f   :  { %s550_s28 = smov 128   ;;  %s551_s0 = smov 8  }
 0x340   :  { %387 = dma.vmem_to_hbm [thread:$0]  %s382_s26, 256, %s703_s2, [#allocation3], %s550_s28, %s550_s28, %s551_s0  }
 0x341   :  { %547 = dma.done.wait [#allocation3], 256  }
 0x342   :  { %548 = vsyncadd [#allocation3], 4294967040 }
 0x343   :  { %391 = vsyncpa [#allocation3], 1 }

</bundles_post_ra>
